<compile_context>
chip_gen: v7x
topology: tpu7x:2x2x1
jax: 0.10.0
libtpu: 0.0.40
codegen_flags: <defaults>
</compile_context>

<pallas_src>
import functools

import jax
import jax.numpy as jnp
from jax.experimental import pallas as pl
from jax.experimental.pallas import tpu as pltpu


def _mlp_encoder_kernel(x_ref, w1_ref, b1_ref, w2_ref, b2_ref, *out_refs,
                        compute_dtype):
    """One row-tile of the fused MLP: x @ w1 + b1 -> ReLU -> @ w2 + b2."""
    # In-kernel cast rides the VPU under the MXU/DMA; x is read from HBM once.
    x = x_ref[...].astype(compute_dtype)

    # Layer 1 on the MXU, f32 accumulation.
    h = jnp.dot(x, w1_ref[...], preferred_element_type=jnp.float32)
    # Bias + ReLU in f32 on the VPU (v5e-safe epilogue).
    h = jnp.maximum(h + b1_ref[...], 0.0)

    # Layer 2: single matmul over the full 2L output width.
    phi = jnp.dot(h.astype(w2_ref.dtype), w2_ref[...],
                  preferred_element_type=jnp.float32)
    phi = phi + b2_ref[...]

    if len(out_refs) == 1:
        # Narrow L (< 128): store one lane-dense phi slab, split in wrapper.
        out_refs[0][...] = phi.astype(out_refs[0].dtype)
    else:
        # L % 128 == 0: split in the epilogue, both stores stay lane-dense.
        mu_ref, logvar_ref = out_refs
        L = mu_ref.shape[-1]
        mu_ref[...] = phi[:, :L].astype(mu_ref.dtype)
        logvar_ref[...] = phi[:, L:].astype(logvar_ref.dtype)


@functools.partial(jax.jit, static_argnames=("tm_rows", "compute_dtype"))
def mlp_encoder_forward(x, params, causal_mask=None, *, tm_rows=512,
                        compute_dtype=jnp.bfloat16):
    """Pallas implementation of MLPEncoder.forward(x, causal_mask).

    x: (B, T, D).  Returns (mu, logvar), each (B, T, L) in x.dtype.
    causal_mask is unused (MLP network), kept for signature parity.
    """
    del causal_mask  # TODO(synk): only relevant if `network` were attention-based.
    w1, b1, w2, b2 = params["w1"], params["b1"], params["w2"], params["b2"]
    B, T, D = x.shape
    H = w1.shape[1]
    two_L = w2.shape[1]
    L = two_L // 2

    M = B * T
    x2d = x.reshape(M, D)  # metadata-only reshape, no HBM copy

    # Row tile: large by default (amortizes ~0.35us/step overhead, fills the
    # MXU); shrink for small M so the parallel grid axis has >= 2 steps and
    # both v7x TensorCores get work.  Keep a multiple of 8 sublanes.
    tm = tm_rows
    if M <= tm:
        tm = max(8, ((-(-M // 2)) + 7) // 8 * 8)
    n_steps = pl.cdiv(M, tm)  # ragged last block is masked by Pallas

    # Weights are pre-cast once (weight-sized, tiny vs x traffic) so their
    # resident VMEM footprint is the compute dtype; biases stay f32.
    w1_c = w1.astype(compute_dtype)
    w2_c = w2.astype(compute_dtype)
    b1_f = b1.astype(jnp.float32).reshape(1, H)
    b2_f = b2.astype(jnp.float32).reshape(1, two_L)

    split_outputs = (L % 128 == 0)

    full = lambda i: (0, 0)        # constant block index -> weights stay resident
    resident = pl.Buffered(1)      # never re-DMA'd -> no double buffer (v7x VMEM)

    in_specs = [
        pl.BlockSpec((tm, D), lambda i: (i, 0)),                       # x row tile
        pl.BlockSpec((D, H), full, pipeline_mode=resident),            # w1
        pl.BlockSpec((1, H), full, pipeline_mode=resident),            # b1
        pl.BlockSpec((H, two_L), full, pipeline_mode=resident),        # w2
        pl.BlockSpec((1, two_L), full, pipeline_mode=resident),        # b2
    ]
    if split_outputs:
        out_shape = (jax.ShapeDtypeStruct((M, L), x.dtype),
                     jax.ShapeDtypeStruct((M, L), x.dtype))
        out_specs = (pl.BlockSpec((tm, L), lambda i: (i, 0)),
                     pl.BlockSpec((tm, L), lambda i: (i, 0)))
    else:
        out_shape = jax.ShapeDtypeStruct((M, two_L), x.dtype)
        out_specs = pl.BlockSpec((tm, two_L), lambda i: (i, 0))

    # VMEM budget: 2x x-tile + 2x out-tiles + single-buffered weights + f32
    # intermediates (h, phi), floored at the 32 MiB scoped default, capped
    # under v7x's 64 MiB physical.
    wbytes = jnp.dtype(compute_dtype).itemsize
    xbytes = x.dtype.itemsize
    obytes = x.dtype.itemsize
    weights_b = (D * H + H * two_L) * wbytes + (H + two_L) * 4
    vmem_limit = (2 * tm * D * xbytes + 2 * tm * two_L * obytes
                  + weights_b + tm * (H + two_L) * 4 + (8 << 20))
    vmem_limit = int(min(max(vmem_limit, 32 << 20), 60 << 20))

    cost = pl.CostEstimate(
        flops=2 * M * (D * H + H * two_L),
        transcendentals=0,
        bytes_accessed=M * D * xbytes + weights_b + M * two_L * obytes)

    # TODO(synk): for very large D (w1 not resident in v7x's 64 MiB VMEM), add a
    # K-reduction grid axis marked "arbitrary" with a (tm, H) f32 VMEM
    # accumulator (pl.when init / finalize) so 512-row tiles survive while w1
    # streams.

    out = pl.pallas_call(
        functools.partial(_mlp_encoder_kernel, compute_dtype=compute_dtype),
        out_shape=out_shape,
        grid_spec=pltpu.PrefetchScalarGridSpec(
            num_scalar_prefetch=0,
            grid=(n_steps,),
            in_specs=in_specs,
            out_specs=out_specs,
        ),
        compiler_params=pltpu.CompilerParams(
            dimension_semantics=("parallel",),
            vmem_limit_bytes=vmem_limit),
        cost_estimate=cost,
    )(x2d, w1_c, b1_f, w2_c, b2_f)

    if split_outputs:
        mu, logvar = out
        mu = mu.reshape(B, T, L)
        logvar = logvar.reshape(B, T, L)
    else:
        phi = out
        mu = phi[:, :L].reshape(B, T, L)        # == torch.chunk(phi, 2, -1)[0]
        logvar = phi[:, L:].reshape(B, T, L)    # == torch.chunk(phi, 2, -1)[1]
    return mu, logvar


def init_params(key, D, H, L, dtype=jnp.float32):
    """Deterministic synthetic parameters for the MLP network."""
    k1, k2, k3, k4 = jax.random.split(key, 4)
    return {
        "w1": jax.random.normal(k1, (D, H), dtype) * 0.1,
        "b1": jax.random.normal(k2, (1, H), dtype) * 0.01,
        "w2": jax.random.normal(k3, (H, 2 * L), dtype) * 0.1,
        "b2": jax.random.normal(k4, (1, 2 * L), dtype) * 0.01,
    }


def _reference_forward(x, params):
    """Pure-JAX f32 reference of network(x) -> chunk(phi, 2, -1)."""
    h = jnp.maximum(x @ params["w1"] + params["b1"][0], 0.0)
    phi = h @ params["w2"] + params["b2"][0]
    L = phi.shape[-1] // 2
    return phi[..., :L], phi[..., L:]


if __name__ == "__main__":
    root_key = jax.random.PRNGKey(0)

    def check(B, T, D, H, L):
        kx, kp = jax.random.split(jax.random.fold_in(root_key, B * 10000 + T * 100 + L))
        x = jax.random.normal(kx, (B, T, D), jnp.float32)
        params = init_params(kp, D, H, L)
        causal_mask = jnp.tril(jnp.ones((T, T), jnp.float32))  # accepted, unused

        mu_ref, lv_ref = _reference_forward(x, params)

        # Exactness: f32 compute path must match the pure-JAX reference tightly.
        mu32, lv32 = mlp_encoder_forward(x, params, causal_mask,
                                         compute_dtype=jnp.float32)
        jax.block_until_ready((mu32, lv32))
        assert mu32.shape == (B, T, L) and lv32.shape == (B, T, L)
        assert jnp.allclose(mu32, mu_ref, atol=1e-5, rtol=1e-5)
        assert jnp.allclose(lv32, lv_ref, atol=1e-5, rtol=1e-5)

        # Performance config: bf16 MXU operands, f32 accumulation.
        mu, lv = mlp_encoder_forward(x, params, causal_mask)
        jax.block_until_ready((mu, lv))
        assert mu.shape == (B, T, L) and lv.shape == (B, T, L)
        assert jnp.allclose(mu, mu_ref, atol=5e-2, rtol=5e-2)
        assert jnp.allclose(lv, lv_ref, atol=5e-2, rtol=5e-2)

    check(2, 8, 32, 64, 16)    # L < 128 -> single phi slab, wrapper split
    check(2, 9, 32, 64, 16)    # ragged last row block (masked edge stores)
    check(2, 8, 32, 64, 128)   # L % 128 == 0 -> two lane-dense kernel outputs

    print("KERNEL_OK")
</pallas_src>

<mosaic_0001>
module attributes {stable_mosaic.version = 11 : i64} {
  func.func @_mlp_encoder_kernel(%arg0: i32, %arg1: memref<8x32xf32, #tpu.memory_space<vmem>>, %arg2: memref<32x64xf32, #tpu.memory_space<vmem>>, %arg3: memref<1x64xf32, #tpu.memory_space<vmem>>, %arg4: memref<64x32xf32, #tpu.memory_space<vmem>>, %arg5: memref<1x32xf32, #tpu.memory_space<vmem>>, %arg6: memref<8x32xf32, #tpu.memory_space<vmem>>) attributes {dimension_semantics = [#tpu.dimension_semantics<parallel>], iteration_bounds = array<i64: 2>, scalar_prefetch = 0 : i64, scratch_operands = 0 : i64, tpu.core_type = #tpu.core_type<tc>, window_params = [{transform_indices = @transform_0, window_bounds = array<i64: 8, 32>}, {pipeline_mode = #tpu.pipeline_mode<synchronous>, transform_indices = @transform_1, window_bounds = array<i64: 32, 64>}, {pipeline_mode = #tpu.pipeline_mode<synchronous>, transform_indices = @transform_2, window_bounds = array<i64: 1, 64>}, {pipeline_mode = #tpu.pipeline_mode<synchronous>, transform_indices = @transform_3, window_bounds = array<i64: 64, 32>}, {pipeline_mode = #tpu.pipeline_mode<synchronous>, transform_indices = @transform_4, window_bounds = array<i64: 1, 32>}, {transform_indices = @transform_5, window_bounds = array<i64: 8, 32>}]} {
    %c0 = arith.constant 0 : index
    %c0_0 = arith.constant 0 : index
    %0 = vector.load %arg1[%c0, %c0_0] : memref<8x32xf32, #tpu.memory_space<vmem>>, vector<8x32xf32>
    %c0_1 = arith.constant 0 : index
    %c0_2 = arith.constant 0 : index
    %1 = vector.load %arg2[%c0_1, %c0_2] : memref<32x64xf32, #tpu.memory_space<vmem>>, vector<32x64xf32>
    %cst = arith.constant dense<0.000000e+00> : vector<8x64xf32>
    %2 = tpu.matmul %0, %1, %cst {dimension_numbers = #tpu.dot_dimension_numbers<[1], [0], [0], [1], [0, 0, 1, 1], [], []>} : vector<8x32xf32>, vector<32x64xf32>, vector<8x64xf32> -> vector<8x64xf32>
    %c0_3 = arith.constant 0 : index
    %c0_4 = arith.constant 0 : index
    %3 = vector.load %arg3[%c0_3, %c0_4] : memref<1x64xf32, #tpu.memory_space<vmem>>, vector<1x64xf32>
    %4 = vector.broadcast %3 : vector<1x64xf32> to vector<8x64xf32>
    %5 = arith.addf %2, %4 : vector<8x64xf32>
    %cst_5 = arith.constant 0.000000e+00 : f32
    %6 = vector.broadcast %cst_5 : f32 to vector<8x64xf32>
    %7 = arith.maximumf %5, %6 : vector<8x64xf32>
    %c0_6 = arith.constant 0 : index
    %c0_7 = arith.constant 0 : index
    %8 = vector.load %arg4[%c0_6, %c0_7] : memref<64x32xf32, #tpu.memory_space<vmem>>, vector<64x32xf32>
    %cst_8 = arith.constant dense<0.000000e+00> : vector<8x32xf32>
    %9 = tpu.matmul %7, %8, %cst_8 {dimension_numbers = #tpu.dot_dimension_numbers<[1], [0], [0], [1], [0, 0, 1, 1], [], []>} : vector<8x64xf32>, vector<64x32xf32>, vector<8x32xf32> -> vector<8x32xf32>
    %c0_9 = arith.constant 0 : index
    %c0_10 = arith.constant 0 : index
    %10 = vector.load %arg5[%c0_9, %c0_10] : memref<1x32xf32, #tpu.memory_space<vmem>>, vector<1x32xf32>
    %11 = vector.broadcast %10 : vector<1x32xf32> to vector<8x32xf32>
    %12 = arith.addf %9, %11 : vector<8x32xf32>
    %c0_11 = arith.constant 0 : index
    %c0_12 = arith.constant 0 : index
    %13 = vector.load %arg6[%c0_11, %c0_12] : memref<8x32xf32, #tpu.memory_space<vmem>>, vector<8x32xf32>
    tpu.vector_store %arg6[%c0_11, %c0_12], %12 {strides = array<i32>} : memref<8x32xf32, #tpu.memory_space<vmem>>, vector<8x32xf32>,
    return
  }
  func.func @transform_0(%arg0: i32) -> (i32, i32) {
    %c0_i32 = arith.constant 0 : i32
    %c0_i32_0 = arith.constant 0 : i32
    return %arg0, %c0_i32 : i32, i32
  }
  func.func @transform_1(%arg0: i32) -> (i32, i32) {
    %c0_i32 = arith.constant 0 : i32
    %c0_i32_0 = arith.constant 0 : i32
    %c0_i32_1 = arith.constant 0 : i32
    return %c0_i32, %c0_i32_0 : i32, i32
  }
  func.func @transform_2(%arg0: i32) -> (i32, i32) {
    %c0_i32 = arith.constant 0 : i32
    %c0_i32_0 = arith.constant 0 : i32
    %c0_i32_1 = arith.constant 0 : i32
    return %c0_i32, %c0_i32_0 : i32, i32
  }
  func.func @transform_3(%arg0: i32) -> (i32, i32) {
    %c0_i32 = arith.constant 0 : i32
    %c0_i32_0 = arith.constant 0 : i32
    %c0_i32_1 = arith.constant 0 : i32
    return %c0_i32, %c0_i32_0 : i32, i32
  }
  func.func @transform_4(%arg0: i32) -> (i32, i32) {
    %c0_i32 = arith.constant 0 : i32
    %c0_i32_0 = arith.constant 0 : i32
    %c0_i32_1 = arith.constant 0 : i32
    return %c0_i32, %c0_i32_0 : i32, i32
  }
  func.func @transform_5(%arg0: i32) -> (i32, i32) {
    %c0_i32 = arith.constant 0 : i32
    %c0_i32_0 = arith.constant 0 : i32
    return %arg0, %c0_i32 : i32, i32
  }
}

</mosaic_0001>

<bundles_post_ra>
// kernel: mlp_encoder_forward.1
= control target key start
LH: loop header
LB: loop body
LE: loop exit
PB: predicated region body
PF: predicated region fallthrough
CT: control target
= control target key end

     0   :  { %s577_s18 = smov 0   ;;  %s641_s0 = inlined_call_operand.vmem [shape: f32[16,32], index: 0, kind: input, shape index: {}]   ;;  %s642_s1 = inlined_call_operand.vmem [shape: f32[32,64], index: 1, kind: input, shape index: {}]   ;;  %s643_s2 = inlined_call_operand.vmem [shape: f32[1,64], index: 2, kind: input, shape index: {}]   ;;  %s644_s3 = inlined_call_operand.vmem [shape: f32[64,32], index: 3, kind: input, shape index: {}]   ;;  %s645_s4 = inlined_call_operand.vmem [shape: f32[1,32], index: 4, kind: input, shape index: {}]   ;;  %s646_s5 = inlined_call_operand.vmem [shape: f32[16,32], index: 5, kind: output, shape index: {}]  }
   0x1 LB: > { %s450_s19 = sadd.s32 4294967295, %s542_s18   ;;  %p454_p0 = scmp.ge.s32.totalorder %s542_s18, 1  ;;  %s542_s18 = sphi %s577_s18, %s15_s18  }
   0x2   : > { %p186_p1 = scmp.lt.s32.totalorder %s542_s18, 3 }
   0x4   : > { %p187_p2 = pnand %p454_p0, %p186_p1 }
   0x5   : > { %v221_v0 = vld [vmem:[%s642_s1] sm:$0xff] (!%p187_p2)  ;;  %v222_v1 = vld [vmem:[%s642_s1 + $0x8] sm:$0xff] (!%p187_p2)  ;;  %v223_v2 = vld [vmem:[%s642_s1 + $0x10] sm:$0xff] (!%p187_p2)  ;;  %v544_v3 = vmov (!%p187_p2), 0.0|0.0   ;;  %vm545_vm0 = vmmov (!%p187_p2), 0   ;;  %v546_v6 = vmov (!%p187_p2), 0.0  }
   0x6   : > { %190 = sbr.rel (%p187_p2) target bundleno = 448 (0x1c0), region = 40  ;;  %507 = vmatprep.subr.bf16.mxu0 (!%p187_p2), %v544_v3  ;;  %v508_v4 = vpack.c.bf16 (!%p187_p2), %v222_v1, %v221_v0  ;;  %v224_v5 = vld [vmem:[%s642_s1 + $0x18] sm:$0xff] (!%p187_p2)  ;;  %485 = vmatprep.mubr.msk.f32.mxu0 (!%p187_p2), %vm545_vm0, %v546_v6  ;;  %p212_p3 = scmp.lt.s32.totalorder (!%p187_p2), %s450_s19, 1  ;;  %v307_v7 = vld [vmem:[%s644_s3] sm:$0xff] (!%p187_p2)  ;;  %v308_v8 = vld [vmem:[%s644_s3 + $0x8] sm:$0xff] (!%p187_p2)  ;;  %vm232_vm1 = vcmask (!%p187_p2), 261120  }
   0x7   : > { %513 = vmatprep.subr.bf16.mxu1 (!%p187_p2), %v544_v3  ;;  %v514_v9 = vpack.c.bf16 (!%p187_p2), %v308_v8, %v307_v7  ;;  %v309_v10 = vld [vmem:[%s644_s3 + $0x10] sm:$0xff] (!%p187_p2)  ;;  %v310_v11 = vld [vmem:[%s644_s3 + $0x18] sm:$0xff] (!%p187_p2)  ;;  %504 = vmatprep.mubr.msk.f32.mxu1 (!%p187_p2), %vm545_vm0, %v546_v6  ;;  %v511_v12 = vpack.c.bf16 (!%p187_p2), %v224_v5, %v223_v2  ;;  %v311_v14 = vld [vmem:[%s644_s3 + $0x20] sm:$0xff] (!%p187_p2)  ;;  %vm322_vm2 = vcmask (!%p187_p2), 523264  }
   0x8   : > { %509 = vmatpush3.bf16.msra.mxu0 (!%p187_p2), %v508_v4  ;;  %v517_v13 = vpack.c.bf16 (!%p187_p2), %v310_v11, %v309_v10  ;;  %v312_v15 = vld [vmem:[%s644_s3 + $0x28] sm:$0xff] (!%p187_p2)  ;;  %v313_v18 = vld [vmem:[%s644_s3 + $0x30] sm:$0xff] (!%p187_p2)  ;;  %v314_v19 = vld [vmem:[%s644_s3 + $0x38] sm:$0xff] (!%p187_p2) }
   0x9   : > { %510 = vmatprep.subr.bf16.mxu0 (!%p187_p2), %v544_v3  ;;  %515 = vmatpush3.bf16.msra.mxu1 (!%p187_p2), %v514_v9  ;;  %v520_v17 = vpack.c.bf16 (!%p187_p2), %v312_v15, %v311_v14  ;;  %v523_v20 = vpack.c.bf16 (!%p187_p2), %v314_v19, %v313_v18  ;;  %v457_v21 = vld [vmem:[%s643_s2] ss:$0 sm:$0xff] (!%p187_p2) }
   0xa   : > { %516 = vmatprep.subr.bf16.mxu1 (!%p187_p2), %v544_v3  ;;  %v459_v26 = vld [vmem:[%s645_s4] ss:$0 sm:$0xff] (!%p187_p2) }
   0xc   : > { %512 = vmatpush3.bf16.msra.mxu0 (!%p187_p2), %v511_v12 }
   0xd   : > { %s648_s19 = smov (!%p212_p3, %s450_s19), 1  ;;  %518 = vmatpush3.bf16.msra.mxu1 %v517_v13 }
   0xe   : > { %s455_s11 = sshll.u32 %s648_s19, 3  ;;  %519 = vmatprep.subr.bf16.mxu1 %v544_v3 }
   0xf   : > { %s215_s20 = scalar_lea.vmem %s641_s0, %s455_s11  ;;  %s219_s30 = scalar_lea.vmem %s646_s5, %s455_s11 }
  0x10   : > { %v220_v16 = vld [vmem:[%s215_s20] sm:$0xff] }
  0x11   : > { %486 = vmatmul.mubr.msk.f32.vlgmr.msra.gmra.mrb[0].mxu0 %vm232_vm1, %v220_v16  ;;  %521 = vmatpush3.bf16.msra.mxu1 %v520_v17 }
  0x12   : > { %522 = vmatprep.subr.bf16.mxu1 %v544_v3 }
  0x15   : > { %524 = vmatpush3.bf16.msra.mxu1 %v523_v20 }
  0xe4   : > { %v302_v22 = vpop.f32.mrb[0].mxu0 }
  0xe5   : > { %v303_v23 = vadd.f32 %v457_v21, %v302_v22  ;;  %v487_v24 = vpop.f32.mrb[1].mxu0 }
  0xe7   : > { %v306_v25 = vmax.f32 %v303_v23, 0.0 }
  0xe9   : > { %505 = vmatmul.mubr.msk.f32.vlgmr.msra.gmra.mrb[0].mxu1 %vm322_vm2, %v306_v25 }
 0x1bc   : > { %v392_v27 = vpop.f32.mrb[0].mxu1 }
 0x1bd   : > { %v393_v28 = vadd.f32 %v459_v26, %v392_v27  ;;  %v506_v29 = vpop.f32.mrb[1].mxu1 }
 0x1bf   : > { %396 = vst.msk [vmem:[%s219_s30] sm:$0xff] %vm232_vm1, %v393_v28 }
 0x1c0 PF: > { %s15_s18 = sadd.s32 1, %s542_s18  }
 0x1c1   : > { %p12_p4 = scmp.ge.s32.totalorder %s15_s18, 4  }
 0x1c3   :  { %14 = sbr.rel (!%p12_p4) target bundleno = 1 (0x1), region = 70 }

</bundles_post_ra>
